<compile_context>
chip_gen: v5e
topology: v5e:2x2
jax: 0.10.0
libtpu: 0.0.40
codegen_flags: <defaults>
</compile_context>

<pallas_src>
import functools

import jax
import jax.numpy as jnp
import numpy as np
from jax import lax
from jax.experimental import pallas as pl
from jax.experimental.pallas import tpu as pltpu

# ---------------------------------------------------------------------------
# Module configuration (see AreaAttention.__init__)
KEY_QUERY_SIZE = 32
AREA_KEY_MODE = "mean"     # k_area = area_sum_k / area_size
AREA_VALUE_MODE = "sum"    # v_area = area_sum_v
MAX_AREA_HEIGHT = 1
MAX_AREA_WIDTH = 2
MEMORY_HEIGHT = 1
DROPOUT_RATE = 0.0         # eval-mode dropout == identity
TOP_K_AREAS = 0            # disabled


# ---------------------------------------------------------------------------
# Pallas kernel: fully fused area attention for the 1x2 / memory_height=1
# configuration.  One grid step processes a block of Bb batch elements.
# TODO(synk): the general ragged integral-image aggregation (arbitrary
# max_area_height/width, memory_height) has no clean fixed-shape Pallas
# equivalent; this kernel is specialized to the module's 1x2 window.
def _area_attention_kernel(q_ref, k_ref, v_ref, o_ref, *, nkv, mxu_dtype):
    # Elementwise aggregation + softmax statistics in f32 (safe on v5e's
    # f32-only VPU/EUP and needed for the tight accuracy budget).
    k_f32 = k_ref[...].astype(jnp.float32)            # (Bb, Nkv, D)
    v_f32 = v_ref[...].astype(jnp.float32)            # (Bb, Nkv, Dv)

    # 1x2 area aggregation built in VMEM.  Roll by nkv-1 == roll left by one
    # along the sequence (sublane) axis on the XLU: x_next[i] = x[(i+1) % nkv].
    # The wrap-around pair (index nkv-1 of the pair half) is masked out of the
    # softmax below.
    k_next = pltpu.roll(k_f32, shift=nkv - 1, axis=1)
    v_next = pltpu.roll(v_f32, shift=nkv - 1, axis=1)
    k_pair = k_f32 + k_next                           # width-2 key SUM
    v_pair = v_f32 + v_next                           # width-2 'sum' area value

    # MXU operands in the caller's dtype (bf16 inputs -> bf16 matmuls).
    q_op = q_ref[...].astype(mxu_dtype)               # (Bb, Nq, D)

    # logits, contracting the feature dim directly (MXU, no transposes).
    # width-1 areas ('mean' key over a size-1 area is just k):
    logits_lo = jnp.einsum("bqd,bkd->bqk", q_op, k_f32.astype(mxu_dtype),
                           preferred_element_type=jnp.float32)    # (Bb,Nq,Nkv)
    # width-2 areas: 'mean' key == (k + k_next)/2; the 1/2 (i.e. 1/area_size)
    # is folded into the (Nq, Nkv) logits half, not the (Nkv, D) keys.
    logits_hi = 0.5 * jnp.einsum("bqd,bkd->bqk", q_op, k_pair.astype(mxu_dtype),
                                 preferred_element_type=jnp.float32)

    # Joint softmax over [logits_lo | logits_hi[..., :nkv-1]] in f32.  The max
    # may include the wrap column (softmax is shift-invariant; exp args stay
    # <= 0); the wrap column's probability mass is zeroed after the exp with a
    # small (1, 1, Nkv) lane mask.
    m = jnp.maximum(jnp.max(logits_lo, axis=-1, keepdims=True),
                    jnp.max(logits_hi, axis=-1, keepdims=True))   # (Bb,Nq,1)
    lane = lax.broadcasted_iota(jnp.int32, (1, 1, nkv), 2)
    pair_mask = (lane < (nkv - 1)).astype(jnp.float32)            # 0 on wrap col
    p_lo = jnp.exp(logits_lo - m)
    p_hi = jnp.exp(logits_hi - m) * pair_mask
    s = (jnp.sum(p_lo, axis=-1, keepdims=True)
         + jnp.sum(p_hi, axis=-1, keepdims=True))                 # (Bb,Nq,1)
    # TODO(synk): pl.reciprocal(..., approx=True) uses the otherwise-idle EUP
    # slot but its ~2^-12 relative error can exceed the 1e-4 accuracy budget.
    inv_s = pl.reciprocal(s, approx=False)

    # out = softmax(logits) @ v_area, normalization applied once on the
    # (Bb, Nq, Dv) accumulator instead of twice on the (Bb, Nq, Nkv) halves.
    acc = jnp.einsum("bqk,bkd->bqd", p_lo.astype(mxu_dtype),
                     v_f32.astype(mxu_dtype),
                     preferred_element_type=jnp.float32)
    acc += jnp.einsum("bqk,bkd->bqd", p_hi.astype(mxu_dtype),
                      v_pair.astype(mxu_dtype),
                      preferred_element_type=jnp.float32)
    o_ref[...] = (acc * inv_s).astype(o_ref.dtype)


def _pick_batch_block(batch, nq, nkv, d, dv, max_block=64,
                      vmem_budget_bytes=16 << 20):
    """Pick the per-grid-step batch block Bb.

    * as large as possible to amortize the ~0.35 us per-grid-step overhead,
    * but grid = batch // Bb is kept >= 2 whenever batch >= 2 so the
      'parallel' batch axis can be sharded across both v7x TensorCores
      (costs nothing on single-TC v5e/v6e),
    * and the estimated f32 per-step working set (live compute tensors plus
      2x double-buffered input blocks) stays under a conservative budget that
      also fits v7x's 64 MiB VMEM / 32 MiB default scoped limit.
    """
    live = nq * d + 2 * nkv * (d + dv) + 2 * nq * nkv + nq * dv   # in-kernel tensors
    dbuf = 2 * (nq * d + nkv * d + nkv * dv) + nq * dv            # pipelined blocks
    per_b_bytes = 4 * (live + dbuf)
    cap = max(1, min(max_block, vmem_budget_bytes // per_b_bytes))
    if batch >= 2:
        cap = max(1, min(cap, batch // 2))   # >= 2 grid steps for v7x megacore
    bb = min(batch, cap)
    while batch % bb:
        bb -= 1
    return bb


def area_attention_pallas(q, k, v, *, mxu_dtype=None):
    B, Nq, D = q.shape
    _, Nkv, Dv = v.shape
    if mxu_dtype is None:
        mxu_dtype = q.dtype          # bf16 inputs -> bf16 MXU operands
    Bb = _pick_batch_block(B, Nq, Nkv, D, Dv)

    kernel = functools.partial(_area_attention_kernel, nkv=Nkv,
                               mxu_dtype=mxu_dtype)
    return pl.pallas_call(
        kernel,
        out_shape=jax.ShapeDtypeStruct((B, Nq, Dv), q.dtype),
        grid_spec=pltpu.PrefetchScalarGridSpec(
            num_scalar_prefetch=0,
            grid=(B // Bb,),
            in_specs=[
                pl.BlockSpec((Bb, Nq, D), lambda b: (b, 0, 0)),
                pl.BlockSpec((Bb, Nkv, D), lambda b: (b, 0, 0)),
                pl.BlockSpec((Bb, Nkv, Dv), lambda b: (b, 0, 0)),
            ],
            out_specs=pl.BlockSpec((Bb, Nq, Dv), lambda b: (b, 0, 0)),
        ),
        compiler_params=pltpu.CompilerParams(
            dimension_semantics=("parallel",)),
    )(q, k, v)


# ---------------------------------------------------------------------------
# Pure-JAX reference mirroring the PyTorch forward (generic integral-image
# path from AreaAttention._compute_sum_image) — used only for verification.
def _compute_sum_image(features):
    B, N, F = features.shape
    W = N // MEMORY_HEIGHT
    f2d = features.reshape(B, MEMORY_HEIGHT, W, F)
    horizontal_integral = jnp.cumsum(f2d, axis=-2)
    vertical_integral = jnp.cumsum(horizontal_integral, axis=-3)
    padded = jnp.pad(vertical_integral, ((0, 0), (1, 0), (1, 0), (0, 0)))

    dst, diag, src_h, src_v, heights, widths = [], [], [], [], [], []
    for ah in range(MAX_AREA_HEIGHT):
        for aw in range(MAX_AREA_WIDTH):
            dst.append(padded[:, ah + 1:, aw + 1:, :].reshape(B, -1, F))
            diag.append(padded[:, :-ah - 1, :-aw - 1, :].reshape(B, -1, F))
            src_h.append(padded[:, ah + 1:, :-aw - 1, :].reshape(B, -1, F))
            src_v.append(padded[:, :-ah - 1, aw + 1:, :].reshape(B, -1, F))
            n_areas = (MEMORY_HEIGHT - ah) * (W - aw)
            heights.append(jnp.full((B, n_areas), ah + 1, jnp.int32))
            widths.append(jnp.full((B, n_areas), aw + 1, jnp.int32))

    sum_image = (jnp.concatenate(dst, axis=1) + jnp.concatenate(diag, axis=1)) \
              - (jnp.concatenate(src_v, axis=1) + jnp.concatenate(src_h, axis=1))
    area_heights = jnp.concatenate(heights, axis=1)[..., None]
    area_widths = jnp.concatenate(widths, axis=1)[..., None]
    return sum_image, area_heights, area_widths


def area_attention_reference(q, k, v):
    area_sum_k, area_h, area_w = _compute_sum_image(k)
    area_sum_v, _, _ = _compute_sum_image(v)
    area_size = (area_h * area_w).astype(jnp.float32)
    k_area = area_sum_k / area_size                      # 'mean' key
    v_area = area_sum_v                                  # 'sum' value
    logits = jnp.einsum("bqd,bad->bqa", q, k_area)
    weights = jax.nn.softmax(logits, axis=-1)
    return jnp.einsum("bqa,bad->bqd", weights, v_area)


if __name__ == "__main__":
    B, Nq, Nkv, D, Dv = 2, 8, 16, KEY_QUERY_SIZE, KEY_QUERY_SIZE
    key = jax.random.PRNGKey(0)
    kq, kk, kv_ = jax.random.split(key, 3)
    q = jax.random.normal(kq, (B, Nq, D), dtype=jnp.float32)
    k = jax.random.normal(kk, (B, Nkv, D), dtype=jnp.float32)
    v = jax.random.normal(kv_, (B, Nkv, Dv), dtype=jnp.float32)

    # f32 path: bit-accurate against the PyTorch-equivalent reference.
    out = jax.block_until_ready(area_attention_pallas(q, k, v))
    ref = jax.block_until_ready(area_attention_reference(q, k, v))
    np.testing.assert_allclose(np.asarray(out), np.asarray(ref),
                               atol=1e-4, rtol=1e-4)
    assert out.shape == (B, Nq, Dv)

    # bf16 path (v6e/v7x production path: bf16 MXU operands, f32 softmax
    # statistics) — smoke-check that it runs and stays close to the f32 ref;
    # the residual error is dominated by bf16 input quantization.
    qb, kb, vb = (x.astype(jnp.bfloat16) for x in (q, k, v))
    out_bf16 = jax.block_until_ready(area_attention_pallas(qb, kb, vb))
    assert out_bf16.shape == (B, Nq, Dv)
    out_bf16_f32 = np.asarray(out_bf16.astype(jnp.float32))
    assert np.all(np.isfinite(out_bf16_f32))
    assert float(np.max(np.abs(out_bf16_f32 - np.asarray(ref)))) < 0.25

    print("KERNEL_OK")
</pallas_src>

<mosaic_0001>
module attributes {stable_mosaic.version = 11 : i64} {
  func.func @_area_attention_kernel(%arg0: i32, %arg1: memref<1x8x32xf32, #tpu.memory_space<vmem>>, %arg2: memref<1x16x32xf32, #tpu.memory_space<vmem>>, %arg3: memref<1x16x32xf32, #tpu.memory_space<vmem>>, %arg4: memref<1x8x32xf32, #tpu.memory_space<vmem>>) attributes {dimension_semantics = [#tpu.dimension_semantics<parallel>], iteration_bounds = array<i64: 2>, scalar_prefetch = 0 : i64, scratch_operands = 0 : i64, tpu.core_type = #tpu.core_type<tc>, window_params = [{transform_indices = @transform_0, window_bounds = array<i64: 1, 8, 32>}, {transform_indices = @transform_1, window_bounds = array<i64: 1, 16, 32>}, {transform_indices = @transform_2, window_bounds = array<i64: 1, 16, 32>}, {transform_indices = @transform_3, window_bounds = array<i64: 1, 8, 32>}]} {
    %c0 = arith.constant 0 : index
    %c0_0 = arith.constant 0 : index
    %c0_1 = arith.constant 0 : index
    %0 = vector.load %arg2[%c0, %c0_0, %c0_1] : memref<1x16x32xf32, #tpu.memory_space<vmem>>, vector<1x16x32xf32>
    %c0_2 = arith.constant 0 : index
    %c0_3 = arith.constant 0 : index
    %c0_4 = arith.constant 0 : index
    %1 = vector.load %arg3[%c0_2, %c0_3, %c0_4] : memref<1x16x32xf32, #tpu.memory_space<vmem>>, vector<1x16x32xf32>
    %c15_i32 = arith.constant 15 : i32
    %2 = tpu.dynamic_rotate %0 by %c15_i32 dim 1 : vector<1x16x32xf32>, i32 -> vector<1x16x32xf32>
    %c15_i32_5 = arith.constant 15 : i32
    %3 = tpu.dynamic_rotate %1 by %c15_i32_5 dim 1 : vector<1x16x32xf32>, i32 -> vector<1x16x32xf32>
    %4 = arith.addf %0, %2 : vector<1x16x32xf32>
    %5 = arith.addf %1, %3 : vector<1x16x32xf32>
    %c0_6 = arith.constant 0 : index
    %c0_7 = arith.constant 0 : index
    %c0_8 = arith.constant 0 : index
    %6 = vector.load %arg1[%c0_6, %c0_7, %c0_8] : memref<1x8x32xf32, #tpu.memory_space<vmem>>, vector<1x8x32xf32>
    "tpu.trace_start"() <{level = 10 : i32, message = "bqd,bkd->bqk"}> : () -> ()
    %cst = arith.constant dense<0.000000e+00> : vector<1x8x16xf32>
    %7 = tpu.matmul %6, %0, %cst {dimension_numbers = #tpu.dot_dimension_numbers<[2], [2], [1], [1], [0, 0, 0, 1, 1, 1], [0], [0]>} : vector<1x8x32xf32>, vector<1x16x32xf32>, vector<1x8x16xf32> -> vector<1x8x16xf32>
    %cst_9 = arith.constant dense<0.000000e+00> : vector<1x8x16xf32>
    %8 = tpu.matmul %6, %4, %cst_9 {dimension_numbers = #tpu.dot_dimension_numbers<[2], [2], [1], [1], [0, 0, 0, 1, 1, 1], [0], [0]>} : vector<1x8x32xf32>, vector<1x16x32xf32>, vector<1x8x16xf32> -> vector<1x8x16xf32>
    "tpu.trace_stop"() : () -> ()
    %cst_10 = arith.constant 5.000000e-01 : f32
    %9 = vector.broadcast %cst_10 : f32 to vector<1x8x16xf32>
    %10 = arith.mulf %9, %8 : vector<1x8x16xf32>
    %cst_11 = arith.constant dense<0xFF800000> : vector<1x8xf32>
    %11 = vector.multi_reduction <maximumf>, %7, %cst_11 [2] : vector<1x8x16xf32> to vector<1x8xf32>
    %12 = vector.shape_cast %11 : vector<1x8xf32> to vector<1x8x1xf32>
    %cst_12 = arith.constant dense<0xFF800000> : vector<1x8xf32>
    %13 = vector.multi_reduction <maximumf>, %10, %cst_12 [2] : vector<1x8x16xf32> to vector<1x8xf32>
    %14 = vector.shape_cast %13 : vector<1x8xf32> to vector<1x8x1xf32>
    %15 = arith.maximumf %12, %14 : vector<1x8x1xf32>
    %16 = tpu.iota {dimensions = array<i32: 2>} : vector<1x1x16xi32>
    %c15_i32_13 = arith.constant 15 : i32
    %17 = vector.broadcast %c15_i32_13 : i32 to vector<1x1x16xi32>
    %18 = arith.cmpi slt, %16, %17 : vector<1x1x16xi32>
    %19 = arith.extui %18 : vector<1x1x16xi1> to vector<1x1x16xi32>
    %20 = arith.sitofp %19 : vector<1x1x16xi32> to vector<1x1x16xf32>
    %21 = vector.broadcast %15 : vector<1x8x1xf32> to vector<1x8x16xf32>
    %22 = arith.subf %7, %21 : vector<1x8x16xf32>
    %23 = math.exp %22 : vector<1x8x16xf32>
    %24 = vector.broadcast %15 : vector<1x8x1xf32> to vector<1x8x16xf32>
    %25 = arith.subf %10, %24 : vector<1x8x16xf32>
    %26 = math.exp %25 : vector<1x8x16xf32>
    %27 = vector.broadcast %20 : vector<1x1x16xf32> to vector<1x8x16xf32>
    %28 = arith.mulf %26, %27 : vector<1x8x16xf32>
    %cst_14 = arith.constant dense<0.000000e+00> : vector<1x8xf32>
    %29 = vector.multi_reduction <add>, %23, %cst_14 [2] : vector<1x8x16xf32> to vector<1x8xf32>
    %30 = vector.shape_cast %29 : vector<1x8xf32> to vector<1x8x1xf32>
    %cst_15 = arith.constant dense<0.000000e+00> : vector<1x8xf32>
    %31 = vector.multi_reduction <add>, %28, %cst_15 [2] : vector<1x8x16xf32> to vector<1x8xf32>
    %32 = vector.shape_cast %31 : vector<1x8xf32> to vector<1x8x1xf32>
    %33 = arith.addf %30, %32 : vector<1x8x1xf32>
    %34 = tpu.reciprocal %33 : vector<1x8x1xf32> -> vector<1x8x1xf32>
    "tpu.trace_start"() <{level = 10 : i32, message = "bqk,bkd->bqd"}> : () -> ()
    %cst_16 = arith.constant dense<0.000000e+00> : vector<1x8x32xf32>
    %35 = tpu.matmul %23, %1, %cst_16 {dimension_numbers = #tpu.dot_dimension_numbers<[2], [1], [1], [2], [0, 0, 0, 1, 1, 2], [0], [0]>} : vector<1x8x16xf32>, vector<1x16x32xf32>, vector<1x8x32xf32> -> vector<1x8x32xf32>
    %cst_17 = arith.constant dense<0.000000e+00> : vector<1x8x32xf32>
    %36 = tpu.matmul %28, %5, %cst_17 {dimension_numbers = #tpu.dot_dimension_numbers<[2], [1], [1], [2], [0, 0, 0, 1, 1, 2], [0], [0]>} : vector<1x8x16xf32>, vector<1x16x32xf32>, vector<1x8x32xf32> -> vector<1x8x32xf32>
    "tpu.trace_stop"() : () -> ()
    %37 = arith.addf %35, %36 : vector<1x8x32xf32>
    %38 = vector.broadcast %34 : vector<1x8x1xf32> to vector<1x8x32xf32>
    %39 = arith.mulf %37, %38 : vector<1x8x32xf32>
    %c0_18 = arith.constant 0 : index
    %c0_19 = arith.constant 0 : index
    %c0_20 = arith.constant 0 : index
    %40 = vector.load %arg4[%c0_18, %c0_19, %c0_20] : memref<1x8x32xf32, #tpu.memory_space<vmem>>, vector<1x8x32xf32>
    tpu.vector_store %arg4[%c0_18, %c0_19, %c0_20], %39 {strides = array<i32>} : memref<1x8x32xf32, #tpu.memory_space<vmem>>, vector<1x8x32xf32>,
    return
  }
  func.func @transform_0(%arg0: i32) -> (i32, i32, i32) {
    %c0_i32 = arith.constant 0 : i32
    %c0_i32_0 = arith.constant 0 : i32
    %c0_i32_1 = arith.constant 0 : i32
    return %arg0, %c0_i32, %c0_i32_0 : i32, i32, i32
  }
  func.func @transform_1(%arg0: i32) -> (i32, i32, i32) {
    %c0_i32 = arith.constant 0 : i32
    %c0_i32_0 = arith.constant 0 : i32
    %c0_i32_1 = arith.constant 0 : i32
    return %arg0, %c0_i32, %c0_i32_0 : i32, i32, i32
  }
  func.func @transform_2(%arg0: i32) -> (i32, i32, i32) {
    %c0_i32 = arith.constant 0 : i32
    %c0_i32_0 = arith.constant 0 : i32
    %c0_i32_1 = arith.constant 0 : i32
    return %arg0, %c0_i32, %c0_i32_0 : i32, i32, i32
  }
  func.func @transform_3(%arg0: i32) -> (i32, i32, i32) {
    %c0_i32 = arith.constant 0 : i32
    %c0_i32_0 = arith.constant 0 : i32
    %c0_i32_1 = arith.constant 0 : i32
    return %arg0, %c0_i32, %c0_i32_0 : i32, i32, i32
  }
}

</mosaic_0001>

<bundles_post_ra>
// kernel: tpu_custom_call.1
= control target key start
LH: loop header
LB: loop body
LE: loop exit
PB: predicated region body
PF: predicated region fallthrough
CT: control target
= control target key end

     0   :  { %s1058_s0 = inlined_call_operand.hbm [shape: f32[2,8,32], index: 0, kind: input, shape index: {}]   ;;  %s1059_s1 = inlined_call_operand.hbm [shape: f32[2,16,32], index: 1, kind: input, shape index: {}]   ;;  %s1060_s2 = inlined_call_operand.hbm [shape: f32[2,16,32], index: 2, kind: input, shape index: {}]   ;;  %s1061_s3 = inlined_call_operand.hbm [shape: f32[2,8,32], index: 3, kind: output, shape index: {}]  }
   0x1   :  { %1065 = sst [smem:[#allocation14_spill]] %s1059_s1 }
   0x2   :  { %8 = vsyncpa [#allocation3], 0 }
   0x3   :  { %10 = vsyncpa [#allocation3 + $0x1], 0 }
   0x4   :  { %11 = vsyncpa [#allocation6], 0 }
   0x5   :  { %13 = vsyncpa [#allocation6 + $0x1], 0 }
   0x6   :  { %14 = vsyncpa [#allocation4], 0 }
   0x7   :  { %16 = vsyncpa [#allocation4 + $0x1], 0  ;;  %s845_s12 = smov 0   ;;  %s847_s13 = smov 0  }
   0x8   :  { %s849_s14 = smov 0   ;;  %s851_s15 = smov 0  }
   0x9 LB: > { %1066 = sst [smem:[#allocation12_spill]] %s816_s14  ;;  %s866_s16 = sadd.s32 4294967295, %s820_s15   ;;  %s820_s15 = sphi %s851_s15, %s1081_s15   ;;  %s816_s14 = sphi %s849_s14, %s1078_s14   ;;  %s812_s13 = sphi %s847_s13, %s1080_s13   ;;  %s808_s12 = sphi %s845_s12, %s1079_s12  }
   0xa   : > { %s564_s17 = sadd.s32 4294967294, %s820_s15   ;;  %s870_s18 = sadd.s32 1, %s820_s15  }
   0xb   : > { %s29_s19 = sadd.s32 1, %s816_s14  ;;  %s26_s20 = ssub.s32 %s820_s15, %s870_s18 }
   0xc   : > { %p36_p0 = scmp.ne.s32.totalorder %s816_s14, %s812_s13  ;;  %p27_p1 = scmp.eq.s32.totalorder %s26_s20, 0 }
   0xd   : > { %p37_p2 = scmp.eq.s32.totalorder %s820_s15, 0  ;;  %p42_p3 = scmp.ne.s32.totalorder %s812_s13, %s808_s12 }
   0xe   : > { %p43_p4 = scmp.eq.s32.totalorder %s866_s16, 0  ;;  %p118_p7 = scmp.eq.s32.totalorder %s866_s16, 1 }
   0xf   : > { %s882_s21 = scalar_select %p27_p1, %s816_s14, %s29_s19  }
  0x10   : > { %p38_p5 = por %p37_p2, %p36_p0  ;;  %p884_p6 = por %p43_p4, %p42_p3 }
  0x11   : > { %1067 = sst [smem:[#allocation13_spill]] %s882_s21  ;;  %p124_p8 = scmp.eq.s32.totalorder %s564_s17, 1 }
  0x12   : > { %p617_p10 = scmp.lt.s32.totalorder %s820_s15, 2  ;;  %p891_p11 = por %p118_p7, %p36_p0 }
  0x13   : > { %p895_p12 = por %p124_p8, %p42_p3  ;;  %s900_s25 = sand.u32 1, %s816_s14  }
  0x14   : > { %p902_p13 = pnand %p617_p10, %p38_p5  ;;  %s163_s27 = sand.u32 1, %s820_s15  }
  0x15   : > { %s569_s28 = sshll.u32 %s900_s25, 4  ;;  %s593_s29 = sshll.u32 %s820_s15, 4 }
  0x16   : > { %s1072_s1 = sld [smem:[#allocation14_spill]]  ;;  %s167_s6 = scalar_lea.vmem [#allocation5], %s569_s28 }
  0x17   : > { %s175_s7 = sshll.u32 %s167_s6, 4  ;;  %s914_s9 = scalar_lea.sflag [#allocation6], %s163_s27  ;;  %s176_s7 = int_to_ptr.vmem [resolvable:$true] %s175_s7 }
  0x18   : > { %p664_p1 = pneg %p902_p13 }
  0x1c   : > { %s172_s5 = scalar_lea.hbm %s1072_s1, %s593_s29  ;;  %s667_s20 = scalar_lea.hbm %s1072_s1, 32 }
  0x1d   : > { %s173_s8 = sshll.u32 %s172_s5, 4  ;;  %s174_s8 = int_to_ptr.hbm [resolvable:$true] %s173_s8 }
  0x1e   : > { %s660_s10 = sshra.s32 %s174_s8, 4  ;;  %s661_s10 = int_to_ptr.hbm [resolvable:$true] %s660_s10 }
  0x1f   : > { %s662_s11 = scalar_lea.hbm %s661_s10, 16  ;;  %p668_p4 = scmp.lt.s32.totalorder %s661_s10, %s1072_s1 }
  0x20   : > { %p663_p0 = scmp.ne.s32.totalorder %s661_s10, %s662_s11  ;;  %p669_p5 = scmp.lt.s32.totalorder %s667_s20, %s662_s11 }
  0x22   : > { %p665_p2 = pnand %p664_p1, %p663_p0  ;;  %p670_p7 = por %p669_p5, %p668_p4 }
  0x24   : > { %p666_p3 = pneg %p665_p2 }
  0x26   : > { %p671_p8 = pnand %p670_p7, %p666_p3 }
  0x28   : > { %674 = shalt.err (!%p671_p8)
}
  0x29   : > { %s1062_s27 = smov 128   ;;  %s1063_s5 = smov 8  }
  0x2a   : > { %609 = dma.hbm_to_vmem [thread:$0]  (!%p902_p13), %s174_s8, 256, %s176_s7, %s914_s9, %s1062_s27, %s1062_s27, %s1063_s5  }
  0x2b   : > { %s194_s11 = scalar_lea.hbm %s1060_s2, %s593_s29  ;;  %s189_s17 = scalar_lea.vmem [#allocation7], %s569_s28 }
  0x2c   : > { %s197_s19 = sshll.u32 %s189_s17, 4  ;;  %s195_s20 = sshll.u32 %s194_s11, 4  ;;  %s938_s19 = int_to_ptr.vmem [resolvable:$true] %s197_s19  ;;  %s940_s20 = int_to_ptr.hbm [resolvable:$true] %s195_s20 }
  0x2d   : > { %p575_p10 = scmp.ge.s32.totalorder %s820_s15, 1  ;;  %p205_p0 = scmp.lt.s32.totalorder %s820_s15, 3 }
  0x2e   : > { %s567_s30 = sshll.u32 %s900_s25, 3  ;;  %s568_s4 = sshll.u32 %s820_s15, 3 }
  0x2f   : > { %p946_p2 = pnand %p575_p10, %p205_p0  ;;  %s152_s28 = scalar_lea.hbm %s1058_s0, %s568_s4 }
  0x30   : > { %s148_s6 = scalar_lea.vmem [#allocation2], %s567_s30  ;;  %s154_s11 = sshll.u32 %s152_s28, 4  ;;  %s155_s11 = int_to_ptr.hbm [resolvable:$true] %s154_s11 }
  0x31   : > { %s156_s10 = sshll.u32 %s148_s6, 4  ;;  %s145_s17 = scalar_lea.sflag [#allocation3], %s900_s25  ;;  %s157_s10 = int_to_ptr.vmem [resolvable:$true] %s156_s10 }
  0x32   : > { %s690_s27 = sshra.s32 %s155_s11, 4  ;;  %s697_s14 = scalar_lea.hbm %s1058_s0, 16  ;;  %s691_s27 = int_to_ptr.hbm [resolvable:$true] %s690_s27 }
  0x33   : > { %s692_s5 = scalar_lea.hbm %s691_s27, 8  ;;  %p698_p7 = scmp.lt.s32.totalorder %s691_s27, %s1058_s0 }
  0x34   : > { %p693_p3 = scmp.ne.s32.totalorder %s691_s27, %s692_s5  ;;  %p699_p8 = scmp.lt.s32.totalorder %s697_s14, %s692_s5 }
  0x36   : > { %p695_p4 = pnand %p693_p3, %p664_p1  ;;  %p700_p10 = por %p699_p8, %p698_p7 }
  0x38   : > { %p696_p5 = pneg %p695_p4 }
  0x3a   : > { %p701_p0 = pnand %p700_p10, %p696_p5 }
  0x3c   : > { %704 = shalt.err (!%p701_p0)
}
  0x3d   : > { %606 = dma.hbm_to_vmem [thread:$0]  (!%p902_p13), %s155_s11, 128, %s157_s10, %s145_s17  }
  0x3e   : > { %s720_s25 = sshra.s32 %s940_s20, 4  ;;  %s727_s14 = scalar_lea.hbm %s1060_s2, 32  ;;  %s721_s25 = int_to_ptr.hbm [resolvable:$true] %s720_s25 }
  0x3f   : > { %s722_s30 = scalar_lea.hbm %s721_s25, 16  ;;  %p728_p5 = scmp.lt.s32.totalorder %s721_s25, %s1060_s2 }
  0x40   : > { %p723_p3 = scmp.ne.s32.totalorder %s721_s25, %s722_s30  ;;  %p729_p7 = scmp.lt.s32.totalorder %s727_s14, %s722_s30 }
  0x42   : > { %p725_p4 = pnand %p723_p3, %p664_p1  ;;  %p730_p8 = por %p729_p7, %p728_p5 }
  0x44   : > { %p726_p9 = pneg %p725_p4 }
  0x46   : > { %p731_p10 = pnand %p730_p8, %p726_p9 }
  0x48   : > { %734 = shalt.err (!%p731_p10)
}
  0x49   : > { %s1074_s29 = smov 8   ;;  %s1075_s28 = smov 128  }
  0x4a   : > { %612 = dma.hbm_to_vmem [thread:$0]  (!%p902_p13), %s940_s20, 256, %s938_s19, %s914_s9, %s1075_s28, %s1075_s28, %s1074_s29  }
  0x4b   : > { %209 = sbr.rel (%p946_p2) target bundleno = 506 (0x1fa), region = 32  ;;  %s986_s6 = sand.u32 (!%p946_p2), 1, %s812_s13  }
  0x4c   : > { %s576_s10 = sshll.u32 (!%p946_p2), %s986_s6, 3  ;;  %s212_s11 = scalar_lea.sflag (!%p946_p2), [#allocation3], %s986_s6 }
  0x4d   : > { %s215_s26 = scalar_lea.vmem (!%p946_p2), [#allocation2], %s576_s10 }
  0x50   : > { %795 = dma.done.wait (%p884_p6), %s212_s11, 128  }
  0x51   : > { %797 = vsyncadd (%p884_p6), %s212_s11, 4294967168  ;;  %s221_s9 = sand.u32 1, %s866_s16   ;;  %s577_s19 = sshll.u32 %s986_s6, 4 }
  0x52   : > { %s222_s20 = scalar_lea.sflag [#allocation6], %s221_s9  ;;  %s225_s7 = scalar_lea.vmem [#allocation5], %s577_s19 }
  0x53   : > { %799 = dma.done.wait (%p884_p6), %s222_s20, 512  }
  0x54   : > { %801 = vsyncadd (%p884_p6), %s222_s20, 4294966784  ;;  %v275_v0 = vlaneseq  ;;  %vm289_vm0 = vcmask 261120   ;;  %v270_v2 = vld [vmem:[%s225_s7 + $0x8] sm:$0xff]  ;;  %v269_v3 = vld [vmem:[%s225_s7] sm:$0xff]  ;;  %vm346_vm2 = vcmask 130048   ;;  %s235_s22 = scalar_lea.vmem [#allocation7], %s577_s19 }
  0x55   : > { %v274_v4 = vrot.slane %v270_v2, 1  ;;  %580 = vmatpush.xpose.msk.msra.mxu0 %vm289_vm0, %v270_v2  ;;  %v273_v5 = vrot.slane %v269_v3, 1  ;;  %v288_v9 = vld [vmem:[%s215_s26] sm:$0xff]  ;;  %v271_v16 = vld [vmem:[%s235_s22] sm:$0xff]  ;;  %v824_v32 = vmov 0.0   ;;  %s590_s17 = sshll.u32 %s866_s16, 3 }
  0x56   : > { %v276_v1 = vshrl.u32 %v275_v0, 7  ;;  %v272_v17 = vld [vmem:[%s235_s22 + $0x8] sm:$0xff]  ;;  %v280_v19 = vrot.slane %v271_v16, 1  ;;  %v355_v31 = vand.u32 127, %v275_v0  ;;  %s446_s25 = scalar_lea.hbm %s1061_s3, %s590_s17  ;;  %s268_s30 = scalar_lea.vmem [#allocation8], %s576_s10 }
  0x57   : > { %v281_v18 = vrot.slane %v272_v17, 1  ;;  %427 = vmatpush.msra.mxu3 %v272_v17  ;;  %s448_s16 = sshll.u32 %s268_s30, 4  ;;  %s450_s1 = sshll.u32 %s446_s25, 4  ;;  %s449_s16 = int_to_ptr.vmem [resolvable:$true] %s448_s16  ;;  %s451_s1 = int_to_ptr.hbm [resolvable:$true] %s450_s1 }
  0x58   : > { %vm277_vm1 = vcmp.lt.s32.totalorder %v276_v1, 7  ;;  %vm356_vm3 = vcmp.lt.s32.totalorder %v355_v31, 15  ;;  %s436_s21 = scalar_lea.sflag [#allocation4], %s986_s6  ;;  %s764_s14 = sshra.s32 %s451_s1, 4  ;;  %s765_s14 = int_to_ptr.hbm [resolvable:$true] %s764_s14 }
  0x59   : > { %v279_v6 = vsel %vm277_vm1, %v274_v4, %v273_v5  ;;  %v278_v7 = vsel %vm277_vm1, %v273_v5, %v274_v4  ;;  %581 = vmatpush.xpose.msk.msra.mxu0 %vm289_vm0, %v269_v3  ;;  %v283_v20 = vsel %vm277_vm1, %v281_v18, %v280_v19  ;;  %428 = vmatpush.msra.mxu3 %v271_v16  ;;  %v586_v33 = vsel %vm356_vm3, 1.0, %v824_v32  ;;  %s766_s27 = scalar_lea.hbm %s765_s14, 8  ;;  %s770_s28 = scalar_lea.hbm %s1061_s3, 16 }
  0x5a   : > { %v285_v8 = vadd.f32 %v279_v6, %v270_v2  ;;  %v284_v10 = vadd.f32 %v278_v7, %v269_v3  ;;  %v287_v21 = vadd.f32 %v283_v20, %v272_v17  ;;  %v282_v22 = vsel %vm277_vm1, %v280_v19, %v281_v18  ;;  %p767_p6 = scmp.ne.s32.totalorder %s765_s14, %s766_s27  ;;  %p771_p1 = scmp.lt.s32.totalorder %s765_s14, %s1061_s3 }
  0x5b   : > { %v286_v23 = vadd.f32 %v282_v22, %v271_v16  ;;  %p772_p2 = scmp.lt.s32.totalorder %s770_s28, %s766_s27 }
  0x5c   : > { %583 = vmatpush.xpose.msk.msra.mxu1 %vm289_vm0, %v285_v8  ;;  %582 = vmatmul.msk.f32.vlgmr.msra.gmra.mxu0 %vm289_vm0, %v288_v9  ;;  %p768_p9 = pnand %p767_p6, %p891_p11 }
  0x5d   : > { %404 = vmatpush.msra.mxu2 %v287_v21  ;;  %p773_p0 = por %p772_p2, %p771_p1 }
  0x5e   : > { %p769_p13 = pneg %p768_p9 }
  0x5f   : > { %405 = vmatpush.msra.mxu2 %v286_v23 }
  0x60   : > { %584 = vmatpush.xpose.msk.msra.mxu1 %vm289_vm0, %v284_v10  ;;  %p774_p3 = pnand %p773_p0, %p769_p13 }
  0x63   : > { %585 = vmatmul.msk.f32.vlgmr.msra.gmra.mxu1 %vm289_vm0, %v288_v9 }
  0xd9   : > { %v316_v11 = vpop.f32.mrf.mxu0 }
  0xda   : > { %v347_v12 = vsel %vm346_vm2, %v316_v11, -inf }
  0xdb   : > { %348 = vmax.xlane.f32.xlu0 %v347_v12 }
  0xe0   : > { %v342_v13 = vpop.f32.mrf.mxu1 }
  0xe1   : > { %v345_v14 = vmul.f32 0.5, %v342_v13 }
  0xe3   : > { %v350_v15 = vsel %vm346_vm2, %v345_v14, -inf }
  0xe4   : > { %351 = vmax.xlane.f32.xlu0 %v350_v15 }
 0x14e   : > { %v349_v24 = vpop.xlane.xlu0 %348 }
 0x157   : > { %v352_v25 = vpop.xlane.xlu0 %351 }
 0x158   : > { %v353_v26 = vmax.f32 %v349_v24, %v352_v25 }
 0x15a   : > { %v359_v27 = vsub.f32 %v316_v11, %v353_v26  ;;  %v362_v28 = vsub.f32 %v345_v14, %v353_v26 }
 0x15c   : > { %v360_v29 = vmul.f32 1.442695, %v359_v27  ;;  %v363_v30 = vmul.f32 1.442695, %v362_v28 }
 0x15e   : > { %654 = vpow2.f32 %v360_v29 }
 0x15f   : > { %656 = vpow2.f32 %v363_v30 }
 0x164   : > { %v655_v34 = vpop.eup %654 }
 0x165   : > { %v657_v35 = vpop.eup %656  ;;  %588 = vmatmul.msk.f32.vlgmr.msra.gmra.mxu3 %vm346_vm2, %v655_v34  ;;  %v366_v36 = vsel %vm346_vm2, %v655_v34, 0.0 }
 0x166   : > { %367 = vadd.xlane.f32.xlu1 %v366_v36  ;;  %v365_v37 = vmul.f32 %v657_v35, %v586_v33 }
 0x168   : > { %587 = vmatmul.msk.f32.vlgmr.msra.gmra.mxu2 %vm346_vm2, %v365_v37  ;;  %v369_v38 = vsel %vm346_vm2, %v365_v37, 0.0 }
 0x16e   : > { %370 = vadd.xlane.f32.xlu1 %v369_v38 }
 0x1d9   : > { %v368_v39 = vpop.xlane.xlu1 %367 }
 0x1e1   : > { %v371_v40 = vpop.xlane.xlu1 %370 }
 0x1e2   : > { %v372_v41 = vadd.f32 %v371_v40, %v368_v39 }
 0x1e4   : > { %658 = vrcp.f32 %v372_v41  ;;  %v384_v45 = vand.u32 2147483648, %v372_v41  ;;  %v382_v47 = vand.u32 2147483647, %v372_v41  ;;  %vm378_vm5 = vweird.f32 %v372_v41 }
 0x1e6   : > { %v385_v51 = vor.u32 1.1754944e-38, %v384_v45  ;;  %vm383_vm7 = vcmp.eq.f32.partialorder %v382_v47, 8.507059e+37 }
 0x1e8   : > { %v430_v50 = vpop.f32.mrf.mxu3 }
 0x1ea   : > { %v659_v42 = vpop.eup %658 }
 0x1eb   : > { %v374_v43 = vmul.f32 %v659_v42, %v372_v41  ;;  %vm379_vm4 = vweird.f32 %v659_v42  ;;  %v407_v48 = vpop.f32.mrf.mxu2 }
 0x1ec   : > { %vm380_vm6 = vmor %vm378_vm5, %vm379_vm4  ;;  %v431_v53 = vadd.f32 %v430_v50, %v407_v48 }
 0x1ed   : > { %v375_v44 = vsub.f32 1.0, %v374_v43 }
 0x1ef   : > { %v376_v46 = vmul.f32 %v659_v42, %v375_v44 }
 0x1f1   : > { %v377_v49 = vadd.f32 %v659_v42, %v376_v46 }
 0x1f3   : > { %v381_v52 = vsel %vm380_vm6, %v659_v42, %v377_v49 }
 0x1f4   : > { %v386_v54 = vsel %vm383_vm7, %v385_v51, %v381_v52 }
 0x1f5   : > { %v433_v55 = vmul.f32 %v431_v53, %v386_v54 }
 0x1f7   : > { %434 = vst.msk [vmem:[%s268_s30] sm:$0xff] %vm289_vm0, %v433_v55 }
 0x1f8   : > { %777 = shalt.err (!%p774_p3)
}
 0x1f9   : > { %601 = dma.vmem_to_hbm [thread:$0]  (%p891_p11), %s449_s16, 128, %s451_s1, %s436_s21  }
 0x1fa PF: > { %s462_s6 = sand.u32 1, %s808_s12   ;;  %p1076_p4 = scmp.ge.s32.totalorder %s820_s15, 2 }
 0x1fb   : > { %s463_s26 = scalar_lea.sflag [#allocation4], %s462_s6 }
 0x1fc   : > { %p614_p5 = pnand %p1076_p4, %p895_p12 }
 0x1fe   : > { %p615_p7 = pneg %p614_p5 }
 0x200   : > { %803 = dma.done.wait (%p615_p7), %s463_s26, 128  }
 0x201   : > { %805 = vsyncadd (%p615_p7), %s463_s26, 4294967168  ;;  %s1077_s9 = sld [smem:[#allocation12_spill]]  ;;  %p19_p8 = scmp.ge.s32.totalorder %s870_s18, 4  }
 0x202   : > { %s1078_s14 = sld [smem:[#allocation13_spill]]  ;;  %s1079_s12 = smov %s812_s13 }
 0x203   : > { %s1081_s15 = smov %s870_s18  ;;  %21 = sbr.rel (!%p19_p8) target bundleno = 9 (0x9), region = 101 }
 0x207   : > { %s1080_s13 = smov %s1077_s9 }
 0x208   :  { %469 = vsyncpa [#allocation3], 1 }
 0x209   :  { %471 = vsyncpa [#allocation3 + $0x1], 1 }
 0x20a   :  { %472 = vsyncpa [#allocation6], 1 }
 0x20b   :  { %474 = vsyncpa [#allocation6 + $0x1], 1 }
 0x20c   :  { %475 = vsyncpa [#allocation4], 1 }
 0x20d   :  { %477 = vsyncpa [#allocation4 + $0x1], 1 }

</bundles_post_ra>
